<compile_context>
chip_gen: v7x
topology: tpu7x:2x2x1
jax: 0.10.0
libtpu: 0.0.40
codegen_flags: <defaults>
</compile_context>

<pallas_src>
import jax
import jax.numpy as jnp
from jax.experimental import pallas as pl
from jax.experimental.pallas import tpu as pltpu

LANE = 128        # keep the 2-class output lane-dense -> unmasked stores
SUBLANE = 8
TILE_T_CAP = 1024  # fits v5e 16 MiB scoped-VMEM default (H<=1024, f32, dbl-buffered)


def _round_up(x, m):
    return ((x + m - 1) // m) * m


def _nsp_head_kernel(x_ref, w_ref, b_ref, o_ref):
    # x_ref: (TILE_T, H)      pooled_output tile (native dtype)
    # w_ref: (H, N_PAD)       classifier weight, pre-transposed + lane-padded
    # b_ref: (1, N_PAD)       classifier bias, lane-padded
    # o_ref: (TILE_T, N_PAD)  lane-dense output tile
    acc = jnp.dot(x_ref[...], w_ref[...], preferred_element_type=jnp.float32)
    acc = acc + b_ref[...].astype(jnp.float32)
    o_ref[...] = acc.astype(o_ref.dtype)


def prepare_nsp_head_params(weight, bias):
    """One-time (model-init) prep: (2, H) torch layout -> (H, 128) + (1, 128)."""
    N, H = weight.shape
    n_pad = _round_up(N, LANE)
    w_t = jnp.zeros((H, n_pad), weight.dtype).at[:, :N].set(weight.T)
    b_p = jnp.zeros((1, n_pad), bias.dtype).at[0, :N].set(bias)
    return w_t, b_p


def _pick_tile_t(B):
    # Largest sublane-aligned tile up to the cap; no materialized row padding
    # (Pallas masks the ragged last block).
    tile = min(TILE_T_CAP, _round_up(B, SUBLANE))
    # For sizable batches keep >= 2 grid points so the "parallel" axis can be
    # sharded across v7x's two TensorCores; at >=128 rows/step the per-step
    # overhead is already well amortized on single-core chips too.
    if B >= 256:
        tile = min(tile, _round_up(pl.cdiv(B, 2), SUBLANE))
    return max(tile, SUBLANE)


def nsp_head_apply(pooled_output, w_t, b_p, n_classes=2):
    """pooled_output: [B, H]; w_t/b_p from prepare_nsp_head_params()."""
    B, H = pooled_output.shape
    n_pad = w_t.shape[1]
    tile_t = _pick_tile_t(B)
    grid = (pl.cdiv(B, tile_t),)

    x_bytes = jnp.dtype(pooled_output.dtype).itemsize
    w_bytes = jnp.dtype(w_t.dtype).itemsize
    b_bytes = jnp.dtype(b_p.dtype).itemsize
    o_bytes = x_bytes
    cost = pl.CostEstimate(
        flops=2 * B * H * n_classes,                 # true N=2, not the padded 128
        transcendentals=0,
        bytes_accessed=(B * H * x_bytes            # activation read
                        + H * n_pad * w_bytes      # resident weight read
                        + n_pad * b_bytes          # resident bias read
                        + B * n_pad * o_bytes),    # padded logits write
    )

    out = pl.pallas_call(
        _nsp_head_kernel,
        out_shape=jax.ShapeDtypeStruct((B, n_pad), pooled_output.dtype),
        grid_spec=pltpu.PrefetchScalarGridSpec(
            num_scalar_prefetch=0,
            grid=grid,
            in_specs=[
                pl.BlockSpec((tile_t, H), lambda i: (i, 0)),   # pooled_output tile
                pl.BlockSpec((H, n_pad), lambda i: (0, 0)),    # W^T (VMEM resident)
                pl.BlockSpec((1, n_pad), lambda i: (0, 0)),    # bias (VMEM resident)
            ],
            out_specs=pl.BlockSpec((tile_t, n_pad), lambda i: (i, 0)),
        ),
        compiler_params=pltpu.CompilerParams(
            dimension_semantics=("parallel",)),
        cost_estimate=cost,
    )(pooled_output, w_t, b_p)

    # Strip the lane padding of the 2-class logits (ragged rows are handled by
    # Pallas' masked writeback; output is exactly [B, n_pad]).
    return out[:, :n_classes]


def bert_only_nsp_head(pooled_output, weight, bias):
    """Convenience wrapper taking the torch nn.Linear layout directly.

    For production, call prepare_nsp_head_params() once at model init and use
    nsp_head_apply() per step, so the transpose/pad is not on the hot path.
    """
    w_t, b_p = prepare_nsp_head_params(weight, bias)
    return nsp_head_apply(pooled_output, w_t, b_p, n_classes=weight.shape[0])


def _reference(pooled_output, weight, bias):
    return jnp.dot(pooled_output, weight.T) + bias


if __name__ == "__main__":
    B, H = 2, 32  # pooled_output is [batch, hidden]
    key = jax.random.PRNGKey(0)
    k1, k2, k3 = jax.random.split(key, 3)

    pooled_output = jax.random.normal(k1, (B, H), dtype=jnp.float32)
    # nn.Linear(hidden_size, 2): weight (2, H), bias (2,)
    weight = jax.random.normal(k2, (2, H), dtype=jnp.float32) * 0.02
    bias = jax.random.normal(k3, (2,), dtype=jnp.float32) * 0.02

    # One-time parameter prep (hoisted out of the per-call path).
    w_t, b_p = prepare_nsp_head_params(weight, bias)

    out = nsp_head_apply(pooled_output, w_t, b_p, n_classes=2)
    out = jax.block_until_ready(out)

    ref = _reference(pooled_output, weight, bias)
    assert out.shape == (B, 2)
    assert jnp.allclose(out, ref, atol=1e-4, rtol=1e-4), "mismatch vs reference"

    print("KERNEL_OK")
</pallas_src>

<mosaic_0001>
module attributes {stable_mosaic.version = 11 : i64} {
  func.func @_nsp_head_kernel(%arg0: i32, %arg1: memref<8x32xf32, #tpu.memory_space<vmem>>, %arg2: memref<32x128xf32, #tpu.memory_space<vmem>>, %arg3: memref<1x128xf32, #tpu.memory_space<vmem>>, %arg4: memref<8x128xf32, #tpu.memory_space<vmem>>) attributes {dimension_semantics = [#tpu.dimension_semantics<parallel>], iteration_bounds = array<i64: 1>, scalar_prefetch = 0 : i64, scratch_operands = 0 : i64, tpu.core_type = #tpu.core_type<tc>, window_params = [{transform_indices = @transform_0, window_bounds = array<i64: 8, 32>}, {pipeline_mode = #tpu.pipeline_mode<synchronous>, transform_indices = @transform_1, window_bounds = array<i64: 32, 128>}, {pipeline_mode = #tpu.pipeline_mode<synchronous>, transform_indices = @transform_2, window_bounds = array<i64: 1, 128>}, {transform_indices = @transform_3, window_bounds = array<i64: 8, 128>}]} {
    %c0 = arith.constant 0 : index
    %c0_0 = arith.constant 0 : index
    %0 = vector.load %arg1[%c0, %c0_0] : memref<8x32xf32, #tpu.memory_space<vmem>>, vector<8x32xf32>
    %c0_1 = arith.constant 0 : index
    %c0_2 = arith.constant 0 : index
    %1 = vector.load %arg2[%c0_1, %c0_2] : memref<32x128xf32, #tpu.memory_space<vmem>>, vector<32x128xf32>
    %cst = arith.constant dense<0.000000e+00> : vector<8x128xf32>
    %2 = tpu.matmul %0, %1, %cst {dimension_numbers = #tpu.dot_dimension_numbers<[1], [0], [0], [1], [0, 0, 1, 1], [], []>} : vector<8x32xf32>, vector<32x128xf32>, vector<8x128xf32> -> vector<8x128xf32>
    %c0_3 = arith.constant 0 : index
    %c0_4 = arith.constant 0 : index
    %3 = vector.load %arg3[%c0_3, %c0_4] : memref<1x128xf32, #tpu.memory_space<vmem>>, vector<1x128xf32>
    %4 = vector.broadcast %3 : vector<1x128xf32> to vector<8x128xf32>
    %5 = arith.addf %2, %4 : vector<8x128xf32>
    %c0_5 = arith.constant 0 : index
    %c0_6 = arith.constant 0 : index
    %6 = vector.load %arg4[%c0_5, %c0_6] : memref<8x128xf32, #tpu.memory_space<vmem>>, vector<8x128xf32>
    tpu.vector_store %arg4[%c0_5, %c0_6], %5 {strides = array<i32>} : memref<8x128xf32, #tpu.memory_space<vmem>>, vector<8x128xf32>,
    return
  }
  func.func @transform_0(%arg0: i32) -> (i32, i32) {
    %c0_i32 = arith.constant 0 : i32
    %c0_i32_0 = arith.constant 0 : i32
    return %arg0, %c0_i32 : i32, i32
  }
  func.func @transform_1(%arg0: i32) -> (i32, i32) {
    %c0_i32 = arith.constant 0 : i32
    %c0_i32_0 = arith.constant 0 : i32
    %c0_i32_1 = arith.constant 0 : i32
    return %c0_i32, %c0_i32_0 : i32, i32
  }
  func.func @transform_2(%arg0: i32) -> (i32, i32) {
    %c0_i32 = arith.constant 0 : i32
    %c0_i32_0 = arith.constant 0 : i32
    %c0_i32_1 = arith.constant 0 : i32
    return %c0_i32, %c0_i32_0 : i32, i32
  }
  func.func @transform_3(%arg0: i32) -> (i32, i32) {
    %c0_i32 = arith.constant 0 : i32
    %c0_i32_0 = arith.constant 0 : i32
    return %arg0, %c0_i32 : i32, i32
  }
}

</mosaic_0001>

<bundles_post_ra>
// kernel: tpu_custom_call.1
= control target key start
LH: loop header
LB: loop body
LE: loop exit
PB: predicated region body
PF: predicated region fallthrough
CT: control target
= control target key end

     0   :  { %8 = vsyncpa [#allocation3], 0  ;;  %s329_s0 = inlined_call_operand.hbm [shape: f32[2,32], index: 0, kind: input, shape index: {}]   ;;  %s330_s1 = inlined_call_operand.hbm [shape: f32[32,128], index: 1, kind: input, shape index: {}]   ;;  %s331_s2 = inlined_call_operand.vmem [shape: f32[1,128], index: 2, kind: input, shape index: {}]   ;;  %s332_s3 = inlined_call_operand.hbm [shape: f32[2,128], index: 3, kind: output, shape index: {}]  }
   0x1   :  { %9 = vsyncpa [#allocation6], 0 }
   0x2   :  { %10 = vsyncpa [#allocation4], 0 }
   0x3   :  { %15 = vsyncadd [#allocation3], 96  ;;  %s254_s12 = smov [#allocation2]   ;;  %s182_s16 = scalar_lea.hbm %s329_s0, 32 }
   0x4   :  { %s16_s13 = sshll.u32 %s254_s12, 4  ;;  %p183_p0 = scmp.ne.s32.totalorder %s329_s0, %s182_s16  ;;  %s17_s13 = int_to_ptr.vmem [resolvable:$true] %s16_s13 }
   0x5   :  { %p186_p1 = scmp.lt.u32.totalorder %s182_s16, %s329_s0 }
   0x7   :  { %p188_p2 = pnand %p186_p1, %p183_p0 }
   0x9   :  { %191 = shalt.err (!%p188_p2)
}
   0xa   :  { %s192_s21 = scalar_lea.vmem %s17_s13, 32  ;;  %s196_s22 = scalar_lea.vmem %s17_s13, 128 }
   0xb   :  { %p193_p3 = scmp.ne.s32.totalorder %s17_s13, %s192_s21  ;;  %p197_p4 = scmp.lt.s32.totalorder %s17_s13, %s17_s13 }
   0xc   :  { %p198_p5 = scmp.lt.s32.totalorder %s196_s22, %s192_s21 }
   0xe   :  { %p199_p6 = por %p198_p5, %p197_p4 }
  0x10   :  { %p200_p7 = pnand %p199_p6, %p193_p3 }
  0x12   :  { %203 = shalt.err (!%p200_p7)
}
  0x13   :  { %s255_s23 = smov 32   ;;  %s256_s24 = smov 2  }
  0x14   :  { %22 = dma.hbm_to_vmem [thread:$0]  %s329_s0, 32, %s17_s13, [#allocation3], %s255_s23, %s255_s23, %s256_s24  }
  0x15   :  { %s257_s27 = smov [#allocation5]   ;;  %s204_s4 = scalar_lea.hbm %s330_s1, 512 }
  0x16   :  { %s28_s28 = sshll.u32 %s257_s27, 4  ;;  %p205_p8 = scmp.ne.s32.totalorder %s330_s1, %s204_s4  ;;  %s29_s28 = int_to_ptr.vmem [resolvable:$true] %s28_s28 }
  0x17   :  { %p208_p9 = scmp.lt.u32.totalorder %s204_s4, %s330_s1 }
  0x19   :  { %p210_p10 = pnand %p208_p9, %p205_p8 }
  0x1b   :  { %213 = shalt.err (!%p210_p10)
}
  0x1c   :  { %s214_s9 = scalar_lea.vmem %s29_s28, 512  ;;  %p219_p12 = scmp.lt.s32.totalorder %s29_s28, %s29_s28 }
  0x1d   :  { %p215_p11 = scmp.ne.s32.totalorder %s29_s28, %s214_s9  ;;  %p220_p13 = scmp.lt.s32.totalorder %s214_s9, %s214_s9 }
  0x1f   :  { %p221_p0 = por %p220_p13, %p219_p12 }
  0x21   :  { %p222_p1 = pnand %p221_p0, %p215_p11 }
  0x23   :  { %225 = shalt.err (!%p222_p1)
}
  0x24   :  { %s258_s0 = smov 128   ;;  %s259_s10 = smov 8  }
  0x25   :  { %34 = dma.hbm_to_vmem [thread:$0]  %s330_s1, 512, %s29_s28, [#allocation6], %s258_s0, %s258_s0, %s259_s10  }
  0x26   :  { %248 = dma.done.wait [#allocation3], 128  }
  0x27   :  { %249 = vsyncadd [#allocation3], 4294967168 }
  0x28   :  { %250 = dma.done.wait [#allocation6], 512  }
  0x29   :  { %251 = vsyncadd [#allocation6], 4294966784  ;;  %v260_v0 = vmov 0.0|0.0   ;;  %vm261_vm0 = vmmov 0   ;;  %v262_v1 = vmov 0.0   ;;  %v44_v2 = vld [vmem:[#allocation5] sm:$0xff] }
  0x2a   :  { %166 = vmatprep.subr.bf16.mxu0 %v260_v0  ;;  %163 = vmatprep.mubr.msk.f32.mxu0 %vm261_vm0, %v262_v1  ;;  %v45_v3 = vld [vmem:[#allocation5 + $0x8] sm:$0xff]  ;;  %v46_v4 = vld [vmem:[#allocation5 + $0x10] sm:$0xff]  ;;  %v47_v6 = vld [vmem:[#allocation5 + $0x18] sm:$0xff]  ;;  %vm55_vm1 = vcmask 261120  }
  0x2b   :  { %v167_v5 = vpack.c.bf16 %v45_v3, %v44_v2  ;;  %v170_v7 = vpack.c.bf16 %v47_v6, %v46_v4  ;;  %v43_v8 = vld [vmem:[#allocation2] sm:$0xff] }
  0x2c   :  { %v148_v9 = vld [vmem:[%s331_s2] ss:$0 sm:$0xff] }
  0x2d   :  { %168 = vmatpush3.bf16.msra.mxu0 %v167_v5 }
  0x2e   :  { %169 = vmatprep.subr.bf16.mxu0 %v260_v0 }
  0x31   :  { %171 = vmatpush3.bf16.msra.mxu0 %v170_v7 }
  0x34   :  { %164 = vmatmul.mubr.msk.f32.vlgmr.msra.gmra.mrb[0].mxu0 %vm55_vm1, %v43_v8 }
 0x107   :  { %v125_v10 = vpop.f32.mrb[0].mxu0 }
 0x108   :  { %v126_v11 = vadd.f32 %v148_v9, %v125_v10  ;;  %v165_v12 = vpop.f32.mrb[1].mxu0 }
 0x10a   :  { %129 = vst [vmem:[#allocation7] sm:$0xff] %v126_v11 }
 0x10b   :  { %134 = vsyncadd [#allocation4], 96  ;;  %s263_s14 = smov [#allocation7]  }
 0x10c   :  { %s135_s15 = sshll.u32 %s263_s14, 4  ;;  %s136_s15 = int_to_ptr.vmem [resolvable:$true] %s135_s15 }
 0x10d   :  { %s226_s16 = scalar_lea.vmem %s136_s15, 32  ;;  %s230_s17 = scalar_lea.vmem %s136_s15, 128 }
 0x10e   :  { %p227_p2 = scmp.ne.s32.totalorder %s136_s15, %s226_s16  ;;  %p231_p3 = scmp.lt.s32.totalorder %s136_s15, %s136_s15 }
 0x10f   :  { %p232_p4 = scmp.lt.s32.totalorder %s230_s17, %s226_s16 }
 0x111   :  { %p233_p5 = por %p232_p4, %p231_p3 }
 0x113   :  { %p234_p6 = pnand %p233_p5, %p227_p2 }
 0x115   :  { %237 = shalt.err (!%p234_p6)
}
 0x116   :  { %s238_s2 = scalar_lea.hbm %s332_s3, 32 }
 0x117   :  { %p239_p7 = scmp.ne.s32.totalorder %s332_s3, %s238_s2  ;;  %p242_p8 = scmp.lt.u32.totalorder %s238_s2, %s332_s3 }
 0x119   :  { %p244_p9 = pnand %p242_p8, %p239_p7 }
 0x11b   :  { %247 = shalt.err (!%p244_p9)
}
 0x11c   :  { %141 = dma.vmem_to_hbm [thread:$0]  %s136_s15, 32, %s332_s3, [#allocation4], %s255_s23, %s255_s23, %s256_s24  }
 0x11d   :  { %252 = dma.done.wait [#allocation4], 128  }
 0x11e   :  { %253 = vsyncadd [#allocation4], 4294967168 }
 0x11f   :  { %145 = vsyncpa [#allocation3], 1 }
 0x120   :  { %146 = vsyncpa [#allocation6], 1 }
 0x121   :  { %147 = vsyncpa [#allocation4], 1 }

</bundles_post_ra>
